<compile_context>
chip_gen: v6e
topology: v6e:2x2x1
jax: 0.10.0
libtpu: 0.0.40
codegen_flags: <defaults>
</compile_context>

<pallas_src>
import functools

import jax
import jax.numpy as jnp
from jax import lax
from jax.experimental import pallas as pl
from jax.experimental.pallas import tpu as pltpu


# ----------------------------------------------------------------------------
# Fused DoubleConv Pallas kernel (one grid step = one image)
# ----------------------------------------------------------------------------
def _down_doubleconv_kernel(x_ref, w1_ref, b1_ref, w2_ref, b2_ref, o_ref,
                            a1_ref, y1_ref, a2_ref, y2_ref, *, Hh, Wh):
    """Fused DoubleConv on a pooled (Cin, Hh*Wh) raster of one image.

    x_ref : (1, Cin, Hh*Wh)        bf16  pooled input, spatial flattened on lanes
    w1_ref: (Cmid, 9*Cin)          bf16  conv1 weights, taps packed into K
    b1_ref: (Cmid, 1)              f32
    w2_ref: (Cout, 9*Cmid)         bf16  conv2 weights, taps packed into K
    b2_ref: (Cout, 1)              f32
    o_ref : (1, Cout, OH2*OW2)     bf16  dense VALID output raster (already cropped)

    scratch:
    a1_ref: (9*Cin,  L1)    bf16  conv1 im2col operand
    y1_ref: (Cmid,   R1+2)  bf16  conv1 activation raster (+4 zero pad lanes)
    a2_ref: (9*Cmid, R2)    bf16  conv2 im2col operand
    y2_ref: (Cout,   R2)    bf16  conv2 activation raster (incl. wrap columns)
    """
    Cin = x_ref.shape[1]
    Cmid = w1_ref.shape[0]
    Cout = w2_ref.shape[0]
    R1 = (Hh - 2) * Wh          # conv1 raster length (incl. wrap columns)
    R2 = (Hh - 4) * Wh          # conv2 raster length (incl. wrap columns)
    L1 = R1 - 2                 # conv1 columns whose taps stay inside x
    OH2, OW2 = Hh - 4, Wh - 4   # valid output spatial size

    # ---- conv1 im2col: 9 shifted ref-sliced copies into VMEM scratch --------
    for t in range(9):
        ki, kj = t // 3, t % 3
        s = ki * Wh + kj
        a1_ref[pl.ds(t * Cin, Cin), :] = x_ref[0, :, pl.ds(s, L1)]

    # ---- conv1 + bias + ReLU: ONE bf16 MXU matmul, f32 accumulation ---------
    acc1 = jnp.dot(w1_ref[...], a1_ref[...], preferred_element_type=jnp.float32)
    y1_ref[:, pl.ds(0, L1)] = jnp.maximum(acc1 + b1_ref[...], 0.0).astype(jnp.bfloat16)
    # Zero the 4 pad lanes; they are only read by conv2 outputs that are never
    # stored (wrap columns), valid outputs read y1 positions <= R1-3.
    y1_ref[:, pl.ds(L1, 4)] = jnp.zeros((Cmid, 4), jnp.bfloat16)

    # ---- conv2 im2col: 9 shifted ref-sliced copies from the y1 scratch ------
    for t in range(9):
        ki, kj = t // 3, t % 3
        s = ki * Wh + kj
        a2_ref[pl.ds(t * Cmid, Cmid), :] = y1_ref[:, pl.ds(s, R2)]

    # ---- conv2 + bias + ReLU: ONE bf16 MXU matmul, f32 accumulation ---------
    acc2 = jnp.dot(w2_ref[...], a2_ref[...], preferred_element_type=jnp.float32)
    y2_ref[...] = jnp.maximum(acc2 + b2_ref[...], 0.0).astype(jnp.bfloat16)

    # ---- store only the OW2 valid columns of each output row (in-kernel crop)
    for r in range(OH2):
        o_ref[0, :, pl.ds(r * OW2, OW2)] = y2_ref[:, pl.ds(r * Wh, OW2)]


# ----------------------------------------------------------------------------
# Wrapper: Down.forward(x) with NCHW in / NCHW out (PyTorch convention)
# ----------------------------------------------------------------------------
def down_forward(params, x_nchw):
    N, Cin, H, W = x_nchw.shape
    assert H % 2 == 0 and W % 2 == 0, "MaxPool2d(2) demo assumes even H, W"
    Hh, Wh = H // 2, W // 2
    assert Hh >= 5 and Wh >= 5, "two valid 3x3 convs need pooled spatial >= 5"

    # XLA prologue (single fused pass): 2x2 max-pool, flatten spatial, bf16 cast.
    xp = x_nchw.reshape(N, Cin, Hh, 2, Wh, 2).max(axis=(3, 5))     # (N,Cin,Hh,Wh)
    xflat = xp.reshape(N, Cin, Hh * Wh).astype(jnp.bfloat16)       # free reshape

    # Pack weights tap-major into the contraction dim: (Co, 9*Ci),
    # index [co, (ki*3+kj)*Ci + ci] == W_oihw[co, ci, ki, kj].
    w1 = params["c1_w"]                      # (Cmid, Cin, 3, 3)  PyTorch OIHW
    w2 = params["c2_w"]                      # (Cout, Cmid, 3, 3)
    Cmid, Cout = w1.shape[0], w2.shape[0]
    w1p = jnp.transpose(w1, (0, 2, 3, 1)).reshape(Cmid, 9 * Cin).astype(jnp.bfloat16)
    w2p = jnp.transpose(w2, (0, 2, 3, 1)).reshape(Cout, 9 * Cmid).astype(jnp.bfloat16)
    b1 = params["c1_b"].reshape(Cmid, 1).astype(jnp.float32)
    b2 = params["c2_b"].reshape(Cout, 1).astype(jnp.float32)

    S = Hh * Wh
    R1 = (Hh - 2) * Wh
    R2 = (Hh - 4) * Wh
    L1 = R1 - 2
    OH2, OW2 = Hh - 4, Wh - 4

    kernel = functools.partial(_down_doubleconv_kernel, Hh=Hh, Wh=Wh)
    out_raster = pl.pallas_call(
        kernel,
        out_shape=jax.ShapeDtypeStruct((N, Cout, OH2 * OW2), jnp.bfloat16),
        grid=(N,),
        in_specs=[
            pl.BlockSpec((1, Cin, S), lambda n: (n, 0, 0)),               # one image
            pl.BlockSpec(memory_space=pltpu.MemorySpace.VMEM),            # w1p (resident)
            pl.BlockSpec(memory_space=pltpu.MemorySpace.VMEM),            # b1
            pl.BlockSpec(memory_space=pltpu.MemorySpace.VMEM),            # w2p
            pl.BlockSpec(memory_space=pltpu.MemorySpace.VMEM),            # b2
        ],
        out_specs=pl.BlockSpec((1, Cout, OH2 * OW2), lambda n: (n, 0, 0)),
        scratch_shapes=[
            pltpu.VMEM((9 * Cin, L1), jnp.bfloat16),      # conv1 im2col
            pltpu.VMEM((Cmid, R1 + 2), jnp.bfloat16),     # y1 raster + 4 pad lanes
            pltpu.VMEM((9 * Cmid, R2), jnp.bfloat16),     # conv2 im2col
            pltpu.VMEM((Cout, R2), jnp.bfloat16),         # y2 raster
        ],
        compiler_params=pltpu.CompilerParams(
            dimension_semantics=("parallel",),
            vmem_limit_bytes=32 * 1024 * 1024),
    )(xflat, w1p, b1, w2p, b2)

    # Free (contiguous) reshape: the kernel already stored only valid columns.
    return out_raster.reshape(N, Cout, OH2, OW2)


# ----------------------------------------------------------------------------
# Pure-JAX f32 reference for correctness
# ----------------------------------------------------------------------------
def reference_forward(params, x_nchw):
    N, Cin, H, W = x_nchw.shape
    xp = x_nchw.reshape(N, Cin, H // 2, 2, W // 2, 2).max(axis=(3, 5))
    x = jnp.transpose(xp, (0, 2, 3, 1))  # NHWC

    def conv_relu(x_nhwc, w_oihw, b):
        w_hwio = jnp.transpose(w_oihw, (2, 3, 1, 0))
        y = lax.conv_general_dilated(x_nhwc, w_hwio, window_strides=(1, 1),
                                     padding="VALID",
                                     dimension_numbers=("NHWC", "HWIO", "NHWC"))
        return jnp.maximum(y + b, 0.0)

    x = conv_relu(x, params["c1_w"], params["c1_b"])
    x = conv_relu(x, params["c2_w"], params["c2_b"])
    return jnp.transpose(x, (0, 3, 1, 2))  # NCHW


# ----------------------------------------------------------------------------
if __name__ == "__main__":
    N = 2
    in_ch, out_ch = 4, 8            # Down(in_channels=4, out_channels=8)
    H = W = 16
    key = jax.random.PRNGKey(0)
    ks = jax.random.split(key, 5)

    x = jax.random.normal(ks[0], (N, in_ch, H, W), jnp.float32)
    params = {
        "c1_w": 0.1 * jax.random.normal(ks[1], (out_ch, in_ch, 3, 3), jnp.float32),
        "c1_b": 0.1 * jax.random.normal(ks[2], (out_ch,), jnp.float32),
        "c2_w": 0.1 * jax.random.normal(ks[3], (out_ch, out_ch, 3, 3), jnp.float32),
        "c2_b": 0.1 * jax.random.normal(ks[4], (out_ch,), jnp.float32),
    }

    out = jax.jit(down_forward)(params, x)
    out = jax.block_until_ready(out)

    assert out.shape == (N, out_ch, H // 2 - 4, W // 2 - 4), out.shape
    ref = reference_forward(params, x)
    out_f32 = out.astype(jnp.float32)
    max_err = float(jnp.max(jnp.abs(out_f32 - ref)))
    assert jnp.allclose(out_f32, ref, atol=5e-2, rtol=5e-2), max_err

    print("KERNEL_OK")
</pallas_src>

<mosaic_0001>
module attributes {stable_mosaic.version = 11 : i64} {
  func.func @_down_doubleconv_kernel(%arg0: i32, %arg1: memref<1x4x64xbf16, #tpu.memory_space<vmem>>, %arg2: memref<8x36xbf16, #tpu.memory_space<vmem>>, %arg3: memref<8x1xf32, #tpu.memory_space<vmem>>, %arg4: memref<8x72xbf16, #tpu.memory_space<vmem>>, %arg5: memref<8x1xf32, #tpu.memory_space<vmem>>, %arg6: memref<1x8x16xbf16, #tpu.memory_space<vmem>>, %arg7: memref<36x46xbf16, #tpu.memory_space<vmem>>, %arg8: memref<8x50xbf16, #tpu.memory_space<vmem>>, %arg9: memref<72x32xbf16, #tpu.memory_space<vmem>>, %arg10: memref<8x32xbf16, #tpu.memory_space<vmem>>) attributes {dimension_semantics = [#tpu.dimension_semantics<parallel>], iteration_bounds = array<i64: 2>, scalar_prefetch = 0 : i64, scratch_operands = 4 : i64, tpu.core_type = #tpu.core_type<tc>, window_params = [{transform_indices = @transform_0, window_bounds = array<i64: 1, 4, 64>}, {pipeline_mode = #tpu.pipeline_mode<synchronous>, transform_indices = @transform_1, window_bounds = array<i64: 8, 36>}, {pipeline_mode = #tpu.pipeline_mode<synchronous>, transform_indices = @transform_2, window_bounds = array<i64: 8, 1>}, {pipeline_mode = #tpu.pipeline_mode<synchronous>, transform_indices = @transform_3, window_bounds = array<i64: 8, 72>}, {pipeline_mode = #tpu.pipeline_mode<synchronous>, transform_indices = @transform_4, window_bounds = array<i64: 8, 1>}, {transform_indices = @transform_5, window_bounds = array<i64: 1, 8, 16>}]} {
    %c0 = arith.constant 0 : index
    %c0_0 = arith.constant 0 : index
    %c0_1 = arith.constant 0 : index
    %0 = vector.load %arg1[%c0, %c0_0, %c0_1] : memref<1x4x64xbf16, #tpu.memory_space<vmem>>, vector<1x4x46xbf16>
    %1 = vector.shape_cast %0 : vector<1x4x46xbf16> to vector<4x46xbf16>
    %c0_2 = arith.constant 0 : index
    %c0_3 = arith.constant 0 : index
    %2 = vector.load %arg7[%c0_2, %c0_3] : memref<36x46xbf16, #tpu.memory_space<vmem>>, vector<4x46xbf16>
    tpu.vector_store %arg7[%c0_2, %c0_3], %1 {strides = array<i32>} : memref<36x46xbf16, #tpu.memory_space<vmem>>, vector<4x46xbf16>,
    %c0_4 = arith.constant 0 : index
    %c0_5 = arith.constant 0 : index
    %c1 = arith.constant 1 : index
    %3 = vector.load %arg1[%c0_4, %c0_5, %c1] : memref<1x4x64xbf16, #tpu.memory_space<vmem>>, vector<1x4x46xbf16>
    %4 = vector.shape_cast %3 : vector<1x4x46xbf16> to vector<4x46xbf16>
    %c4 = arith.constant 4 : index
    %c0_6 = arith.constant 0 : index
    %5 = vector.load %arg7[%c4, %c0_6] : memref<36x46xbf16, #tpu.memory_space<vmem>>, vector<4x46xbf16>
    tpu.vector_store %arg7[%c4, %c0_6], %4 {strides = array<i32>} : memref<36x46xbf16, #tpu.memory_space<vmem>>, vector<4x46xbf16>,
    %c0_7 = arith.constant 0 : index
    %c0_8 = arith.constant 0 : index
    %c2 = arith.constant 2 : index
    %6 = vector.load %arg1[%c0_7, %c0_8, %c2] : memref<1x4x64xbf16, #tpu.memory_space<vmem>>, vector<1x4x46xbf16>
    %7 = vector.shape_cast %6 : vector<1x4x46xbf16> to vector<4x46xbf16>
    %c8 = arith.constant 8 : index
    %c0_9 = arith.constant 0 : index
    %8 = vector.load %arg7[%c8, %c0_9] : memref<36x46xbf16, #tpu.memory_space<vmem>>, vector<4x46xbf16>
    tpu.vector_store %arg7[%c8, %c0_9], %7 {strides = array<i32>} : memref<36x46xbf16, #tpu.memory_space<vmem>>, vector<4x46xbf16>,
    %c0_10 = arith.constant 0 : index
    %c0_11 = arith.constant 0 : index
    %c8_12 = arith.constant 8 : index
    %9 = vector.load %arg1[%c0_10, %c0_11, %c8_12] : memref<1x4x64xbf16, #tpu.memory_space<vmem>>, vector<1x4x46xbf16>
    %10 = vector.shape_cast %9 : vector<1x4x46xbf16> to vector<4x46xbf16>
    %c12 = arith.constant 12 : index
    %c0_13 = arith.constant 0 : index
    %11 = vector.load %arg7[%c12, %c0_13] : memref<36x46xbf16, #tpu.memory_space<vmem>>, vector<4x46xbf16>
    tpu.vector_store %arg7[%c12, %c0_13], %10 {strides = array<i32>} : memref<36x46xbf16, #tpu.memory_space<vmem>>, vector<4x46xbf16>,
    %c0_14 = arith.constant 0 : index
    %c0_15 = arith.constant 0 : index
    %c9 = arith.constant 9 : index
    %12 = vector.load %arg1[%c0_14, %c0_15, %c9] : memref<1x4x64xbf16, #tpu.memory_space<vmem>>, vector<1x4x46xbf16>
    %13 = vector.shape_cast %12 : vector<1x4x46xbf16> to vector<4x46xbf16>
    %c16 = arith.constant 16 : index
    %c0_16 = arith.constant 0 : index
    %14 = vector.load %arg7[%c16, %c0_16] : memref<36x46xbf16, #tpu.memory_space<vmem>>, vector<4x46xbf16>
    tpu.vector_store %arg7[%c16, %c0_16], %13 {strides = array<i32>} : memref<36x46xbf16, #tpu.memory_space<vmem>>, vector<4x46xbf16>,
    %c0_17 = arith.constant 0 : index
    %c0_18 = arith.constant 0 : index
    %c10 = arith.constant 10 : index
    %15 = vector.load %arg1[%c0_17, %c0_18, %c10] : memref<1x4x64xbf16, #tpu.memory_space<vmem>>, vector<1x4x46xbf16>
    %16 = vector.shape_cast %15 : vector<1x4x46xbf16> to vector<4x46xbf16>
    %c20 = arith.constant 20 : index
    %c0_19 = arith.constant 0 : index
    %17 = vector.load %arg7[%c20, %c0_19] : memref<36x46xbf16, #tpu.memory_space<vmem>>, vector<4x46xbf16>
    tpu.vector_store %arg7[%c20, %c0_19], %16 {strides = array<i32>} : memref<36x46xbf16, #tpu.memory_space<vmem>>, vector<4x46xbf16>,
    %c0_20 = arith.constant 0 : index
    %c0_21 = arith.constant 0 : index
    %c16_22 = arith.constant 16 : index
    %18 = vector.load %arg1[%c0_20, %c0_21, %c16_22] : memref<1x4x64xbf16, #tpu.memory_space<vmem>>, vector<1x4x46xbf16>
    %19 = vector.shape_cast %18 : vector<1x4x46xbf16> to vector<4x46xbf16>
    %c24 = arith.constant 24 : index
    %c0_23 = arith.constant 0 : index
    %20 = vector.load %arg7[%c24, %c0_23] : memref<36x46xbf16, #tpu.memory_space<vmem>>, vector<4x46xbf16>
    tpu.vector_store %arg7[%c24, %c0_23], %19 {strides = array<i32>} : memref<36x46xbf16, #tpu.memory_space<vmem>>, vector<4x46xbf16>,
    %c0_24 = arith.constant 0 : index
    %c0_25 = arith.constant 0 : index
    %c17 = arith.constant 17 : index
    %21 = vector.load %arg1[%c0_24, %c0_25, %c17] : memref<1x4x64xbf16, #tpu.memory_space<vmem>>, vector<1x4x46xbf16>
    %22 = vector.shape_cast %21 : vector<1x4x46xbf16> to vector<4x46xbf16>
    %c28 = arith.constant 28 : index
    %c0_26 = arith.constant 0 : index
    %23 = vector.load %arg7[%c28, %c0_26] : memref<36x46xbf16, #tpu.memory_space<vmem>>, vector<4x46xbf16>
    tpu.vector_store %arg7[%c28, %c0_26], %22 {strides = array<i32>} : memref<36x46xbf16, #tpu.memory_space<vmem>>, vector<4x46xbf16>,
    %c0_27 = arith.constant 0 : index
    %c0_28 = arith.constant 0 : index
    %c18 = arith.constant 18 : index
    %24 = vector.load %arg1[%c0_27, %c0_28, %c18] : memref<1x4x64xbf16, #tpu.memory_space<vmem>>, vector<1x4x46xbf16>
    %25 = vector.shape_cast %24 : vector<1x4x46xbf16> to vector<4x46xbf16>
    %c32 = arith.constant 32 : index
    %c0_29 = arith.constant 0 : index
    %26 = vector.load %arg7[%c32, %c0_29] : memref<36x46xbf16, #tpu.memory_space<vmem>>, vector<4x46xbf16>
    tpu.vector_store %arg7[%c32, %c0_29], %25 {strides = array<i32>} : memref<36x46xbf16, #tpu.memory_space<vmem>>, vector<4x46xbf16>,
    %c0_30 = arith.constant 0 : index
    %c0_31 = arith.constant 0 : index
    %27 = vector.load %arg2[%c0_30, %c0_31] : memref<8x36xbf16, #tpu.memory_space<vmem>>, vector<8x36xbf16>
    %c0_32 = arith.constant 0 : index
    %c0_33 = arith.constant 0 : index
    %28 = vector.load %arg7[%c0_32, %c0_33] : memref<36x46xbf16, #tpu.memory_space<vmem>>, vector<36x46xbf16>
    %cst = arith.constant dense<0.000000e+00> : vector<8x46xf32>
    %29 = tpu.matmul %27, %28, %cst {dimension_numbers = #tpu.dot_dimension_numbers<[1], [0], [0], [1], [0, 0, 1, 1], [], []>} : vector<8x36xbf16>, vector<36x46xbf16>, vector<8x46xf32> -> vector<8x46xf32>
    %c0_34 = arith.constant 0 : index
    %c0_35 = arith.constant 0 : index
    %30 = vector.load %arg3[%c0_34, %c0_35] : memref<8x1xf32, #tpu.memory_space<vmem>>, vector<8x1xf32>
    %31 = vector.broadcast %30 : vector<8x1xf32> to vector<8x46xf32>
    %32 = arith.addf %29, %31 : vector<8x46xf32>
    %cst_36 = arith.constant 0.000000e+00 : f32
    %33 = vector.broadcast %cst_36 : f32 to vector<8x46xf32>
    %34 = arith.maximumf %32, %33 : vector<8x46xf32>
    %35 = arith.truncf %34 : vector<8x46xf32> to vector<8x46xbf16>
    %c0_37 = arith.constant 0 : index
    %c0_38 = arith.constant 0 : index
    %36 = vector.load %arg8[%c0_37, %c0_38] : memref<8x50xbf16, #tpu.memory_space<vmem>>, vector<8x46xbf16>
    tpu.vector_store %arg8[%c0_37, %c0_38], %35 {strides = array<i32>} : memref<8x50xbf16, #tpu.memory_space<vmem>>, vector<8x46xbf16>,
    %cst_39 = arith.constant 0.000000e+00 : bf16
    %37 = vector.broadcast %cst_39 : bf16 to vector<8x4xbf16>
    %c0_40 = arith.constant 0 : index
    %c46 = arith.constant 46 : index
    %38 = vector.load %arg8[%c0_40, %c46] : memref<8x50xbf16, #tpu.memory_space<vmem>>, vector<8x4xbf16>
    tpu.vector_store %arg8[%c0_40, %c46], %37 {strides = array<i32>} : memref<8x50xbf16, #tpu.memory_space<vmem>>, vector<8x4xbf16>,
    %c0_41 = arith.constant 0 : index
    %c0_42 = arith.constant 0 : index
    %39 = vector.load %arg8[%c0_41, %c0_42] : memref<8x50xbf16, #tpu.memory_space<vmem>>, vector<8x32xbf16>
    %c0_43 = arith.constant 0 : index
    %c0_44 = arith.constant 0 : index
    %40 = vector.load %arg9[%c0_43, %c0_44] : memref<72x32xbf16, #tpu.memory_space<vmem>>, vector<8x32xbf16>
    tpu.vector_store %arg9[%c0_43, %c0_44], %39 {strides = array<i32>} : memref<72x32xbf16, #tpu.memory_space<vmem>>, vector<8x32xbf16>,
    %c0_45 = arith.constant 0 : index
    %c1_46 = arith.constant 1 : index
    %41 = vector.load %arg8[%c0_45, %c1_46] : memref<8x50xbf16, #tpu.memory_space<vmem>>, vector<8x32xbf16>
    %c8_47 = arith.constant 8 : index
    %c0_48 = arith.constant 0 : index
    %42 = vector.load %arg9[%c8_47, %c0_48] : memref<72x32xbf16, #tpu.memory_space<vmem>>, vector<8x32xbf16>
    tpu.vector_store %arg9[%c8_47, %c0_48], %41 {strides = array<i32>} : memref<72x32xbf16, #tpu.memory_space<vmem>>, vector<8x32xbf16>,
    %c0_49 = arith.constant 0 : index
    %c2_50 = arith.constant 2 : index
    %43 = vector.load %arg8[%c0_49, %c2_50] : memref<8x50xbf16, #tpu.memory_space<vmem>>, vector<8x32xbf16>
    %c16_51 = arith.constant 16 : index
    %c0_52 = arith.constant 0 : index
    %44 = vector.load %arg9[%c16_51, %c0_52] : memref<72x32xbf16, #tpu.memory_space<vmem>>, vector<8x32xbf16>
    tpu.vector_store %arg9[%c16_51, %c0_52], %43 {strides = array<i32>} : memref<72x32xbf16, #tpu.memory_space<vmem>>, vector<8x32xbf16>,
    %c0_53 = arith.constant 0 : index
    %c8_54 = arith.constant 8 : index
    %45 = vector.load %arg8[%c0_53, %c8_54] : memref<8x50xbf16, #tpu.memory_space<vmem>>, vector<8x32xbf16>
    %c24_55 = arith.constant 24 : index
    %c0_56 = arith.constant 0 : index
    %46 = vector.load %arg9[%c24_55, %c0_56] : memref<72x32xbf16, #tpu.memory_space<vmem>>, vector<8x32xbf16>
    tpu.vector_store %arg9[%c24_55, %c0_56], %45 {strides = array<i32>} : memref<72x32xbf16, #tpu.memory_space<vmem>>, vector<8x32xbf16>,
    %c0_57 = arith.constant 0 : index
    %c9_58 = arith.constant 9 : index
    %47 = vector.load %arg8[%c0_57, %c9_58] : memref<8x50xbf16, #tpu.memory_space<vmem>>, vector<8x32xbf16>
    %c32_59 = arith.constant 32 : index
    %c0_60 = arith.constant 0 : index
    %48 = vector.load %arg9[%c32_59, %c0_60] : memref<72x32xbf16, #tpu.memory_space<vmem>>, vector<8x32xbf16>
    tpu.vector_store %arg9[%c32_59, %c0_60], %47 {strides = array<i32>} : memref<72x32xbf16, #tpu.memory_space<vmem>>, vector<8x32xbf16>,
    %c0_61 = arith.constant 0 : index
    %c10_62 = arith.constant 10 : index
    %49 = vector.load %arg8[%c0_61, %c10_62] : memref<8x50xbf16, #tpu.memory_space<vmem>>, vector<8x32xbf16>
    %c40 = arith.constant 40 : index
    %c0_63 = arith.constant 0 : index
    %50 = vector.load %arg9[%c40, %c0_63] : memref<72x32xbf16, #tpu.memory_space<vmem>>, vector<8x32xbf16>
    tpu.vector_store %arg9[%c40, %c0_63], %49 {strides = array<i32>} : memref<72x32xbf16, #tpu.memory_space<vmem>>, vector<8x32xbf16>,
    %c0_64 = arith.constant 0 : index
    %c16_65 = arith.constant 16 : index
    %51 = vector.load %arg8[%c0_64, %c16_65] : memref<8x50xbf16, #tpu.memory_space<vmem>>, vector<8x32xbf16>
    %c48 = arith.constant 48 : index
    %c0_66 = arith.constant 0 : index
    %52 = vector.load %arg9[%c48, %c0_66] : memref<72x32xbf16, #tpu.memory_space<vmem>>, vector<8x32xbf16>
    tpu.vector_store %arg9[%c48, %c0_66], %51 {strides = array<i32>} : memref<72x32xbf16, #tpu.memory_space<vmem>>, vector<8x32xbf16>,
    %c0_67 = arith.constant 0 : index
    %c17_68 = arith.constant 17 : index
    %53 = vector.load %arg8[%c0_67, %c17_68] : memref<8x50xbf16, #tpu.memory_space<vmem>>, vector<8x32xbf16>
    %c56 = arith.constant 56 : index
    %c0_69 = arith.constant 0 : index
    %54 = vector.load %arg9[%c56, %c0_69] : memref<72x32xbf16, #tpu.memory_space<vmem>>, vector<8x32xbf16>
    tpu.vector_store %arg9[%c56, %c0_69], %53 {strides = array<i32>} : memref<72x32xbf16, #tpu.memory_space<vmem>>, vector<8x32xbf16>,
    %c0_70 = arith.constant 0 : index
    %c18_71 = arith.constant 18 : index
    %55 = vector.load %arg8[%c0_70, %c18_71] : memref<8x50xbf16, #tpu.memory_space<vmem>>, vector<8x32xbf16>
    %c64 = arith.constant 64 : index
    %c0_72 = arith.constant 0 : index
    %56 = vector.load %arg9[%c64, %c0_72] : memref<72x32xbf16, #tpu.memory_space<vmem>>, vector<8x32xbf16>
    tpu.vector_store %arg9[%c64, %c0_72], %55 {strides = array<i32>} : memref<72x32xbf16, #tpu.memory_space<vmem>>, vector<8x32xbf16>,
    %c0_73 = arith.constant 0 : index
    %c0_74 = arith.constant 0 : index
    %57 = vector.load %arg4[%c0_73, %c0_74] : memref<8x72xbf16, #tpu.memory_space<vmem>>, vector<8x72xbf16>
    %c0_75 = arith.constant 0 : index
    %c0_76 = arith.constant 0 : index
    %58 = vector.load %arg9[%c0_75, %c0_76] : memref<72x32xbf16, #tpu.memory_space<vmem>>, vector<72x32xbf16>
    %cst_77 = arith.constant dense<0.000000e+00> : vector<8x32xf32>
    %59 = tpu.matmul %57, %58, %cst_77 {dimension_numbers = #tpu.dot_dimension_numbers<[1], [0], [0], [1], [0, 0, 1, 1], [], []>} : vector<8x72xbf16>, vector<72x32xbf16>, vector<8x32xf32> -> vector<8x32xf32>
    %c0_78 = arith.constant 0 : index
    %c0_79 = arith.constant 0 : index
    %60 = vector.load %arg5[%c0_78, %c0_79] : memref<8x1xf32, #tpu.memory_space<vmem>>, vector<8x1xf32>
    %61 = vector.broadcast %60 : vector<8x1xf32> to vector<8x32xf32>
    %62 = arith.addf %59, %61 : vector<8x32xf32>
    %cst_80 = arith.constant 0.000000e+00 : f32
    %63 = vector.broadcast %cst_80 : f32 to vector<8x32xf32>
    %64 = arith.maximumf %62, %63 : vector<8x32xf32>
    %65 = arith.truncf %64 : vector<8x32xf32> to vector<8x32xbf16>
    %c0_81 = arith.constant 0 : index
    %c0_82 = arith.constant 0 : index
    %66 = vector.load %arg10[%c0_81, %c0_82] : memref<8x32xbf16, #tpu.memory_space<vmem>>, vector<8x32xbf16>
    tpu.vector_store %arg10[%c0_81, %c0_82], %65 {strides = array<i32>} : memref<8x32xbf16, #tpu.memory_space<vmem>>, vector<8x32xbf16>,
    %c0_83 = arith.constant 0 : index
    %c0_84 = arith.constant 0 : index
    %67 = vector.load %arg10[%c0_83, %c0_84] : memref<8x32xbf16, #tpu.memory_space<vmem>>, vector<8x4xbf16>
    %c0_85 = arith.constant 0 : index
    %c0_86 = arith.constant 0 : index
    %c0_87 = arith.constant 0 : index
    %68 = vector.load %arg6[%c0_85, %c0_86, %c0_87] : memref<1x8x16xbf16, #tpu.memory_space<vmem>>, vector<1x8x4xbf16>
    %69 = vector.shape_cast %68 : vector<1x8x4xbf16> to vector<8x4xbf16>
    %70 = vector.shape_cast %67 : vector<8x4xbf16> to vector<1x8x4xbf16>
    tpu.vector_store %arg6[%c0_85, %c0_86, %c0_87], %70 {strides = array<i32>} : memref<1x8x16xbf16, #tpu.memory_space<vmem>>, vector<1x8x4xbf16>,
    %c0_88 = arith.constant 0 : index
    %c8_89 = arith.constant 8 : index
    %71 = vector.load %arg10[%c0_88, %c8_89] : memref<8x32xbf16, #tpu.memory_space<vmem>>, vector<8x4xbf16>
    %c0_90 = arith.constant 0 : index
    %c0_91 = arith.constant 0 : index
    %c4_92 = arith.constant 4 : index
    %72 = vector.load %arg6[%c0_90, %c0_91, %c4_92] : memref<1x8x16xbf16, #tpu.memory_space<vmem>>, vector<1x8x4xbf16>
    %73 = vector.shape_cast %72 : vector<1x8x4xbf16> to vector<8x4xbf16>
    %74 = vector.shape_cast %71 : vector<8x4xbf16> to vector<1x8x4xbf16>
    tpu.vector_store %arg6[%c0_90, %c0_91, %c4_92], %74 {strides = array<i32>} : memref<1x8x16xbf16, #tpu.memory_space<vmem>>, vector<1x8x4xbf16>,
    %c0_93 = arith.constant 0 : index
    %c16_94 = arith.constant 16 : index
    %75 = vector.load %arg10[%c0_93, %c16_94] : memref<8x32xbf16, #tpu.memory_space<vmem>>, vector<8x4xbf16>
    %c0_95 = arith.constant 0 : index
    %c0_96 = arith.constant 0 : index
    %c8_97 = arith.constant 8 : index
    %76 = vector.load %arg6[%c0_95, %c0_96, %c8_97] : memref<1x8x16xbf16, #tpu.memory_space<vmem>>, vector<1x8x4xbf16>
    %77 = vector.shape_cast %76 : vector<1x8x4xbf16> to vector<8x4xbf16>
    %78 = vector.shape_cast %75 : vector<8x4xbf16> to vector<1x8x4xbf16>
    tpu.vector_store %arg6[%c0_95, %c0_96, %c8_97], %78 {strides = array<i32>} : memref<1x8x16xbf16, #tpu.memory_space<vmem>>, vector<1x8x4xbf16>,
    %c0_98 = arith.constant 0 : index
    %c24_99 = arith.constant 24 : index
    %79 = vector.load %arg10[%c0_98, %c24_99] : memref<8x32xbf16, #tpu.memory_space<vmem>>, vector<8x4xbf16>
    %c0_100 = arith.constant 0 : index
    %c0_101 = arith.constant 0 : index
    %c12_102 = arith.constant 12 : index
    %80 = vector.load %arg6[%c0_100, %c0_101, %c12_102] : memref<1x8x16xbf16, #tpu.memory_space<vmem>>, vector<1x8x4xbf16>
    %81 = vector.shape_cast %80 : vector<1x8x4xbf16> to vector<8x4xbf16>
    %82 = vector.shape_cast %79 : vector<8x4xbf16> to vector<1x8x4xbf16>
    tpu.vector_store %arg6[%c0_100, %c0_101, %c12_102], %82 {strides = array<i32>} : memref<1x8x16xbf16, #tpu.memory_space<vmem>>, vector<1x8x4xbf16>,
    return
  }
  func.func @transform_0(%arg0: i32) -> (i32, i32, i32) {
    %c0_i32 = arith.constant 0 : i32
    %c0_i32_0 = arith.constant 0 : i32
    %c0_i32_1 = arith.constant 0 : i32
    return %arg0, %c0_i32, %c0_i32_0 : i32, i32, i32
  }
  func.func @transform_1(%arg0: i32) -> (i32, i32) {
    %c0_i32 = arith.constant 0 : i32
    %c0_i32_0 = arith.constant 0 : i32
    %c0_i32_1 = arith.constant 0 : i32
    return %c0_i32, %c0_i32_0 : i32, i32
  }
  func.func @transform_2(%arg0: i32) -> (i32, i32) {
    %c0_i32 = arith.constant 0 : i32
    %c0_i32_0 = arith.constant 0 : i32
    %c0_i32_1 = arith.constant 0 : i32
    return %c0_i32, %c0_i32_0 : i32, i32
  }
  func.func @transform_3(%arg0: i32) -> (i32, i32) {
    %c0_i32 = arith.constant 0 : i32
    %c0_i32_0 = arith.constant 0 : i32
    %c0_i32_1 = arith.constant 0 : i32
    return %c0_i32, %c0_i32_0 : i32, i32
  }
  func.func @transform_4(%arg0: i32) -> (i32, i32) {
    %c0_i32 = arith.constant 0 : i32
    %c0_i32_0 = arith.constant 0 : i32
    %c0_i32_1 = arith.constant 0 : i32
    return %c0_i32, %c0_i32_0 : i32, i32
  }
  func.func @transform_5(%arg0: i32) -> (i32, i32, i32) {
    %c0_i32 = arith.constant 0 : i32
    %c0_i32_0 = arith.constant 0 : i32
    %c0_i32_1 = arith.constant 0 : i32
    return %arg0, %c0_i32, %c0_i32_0 : i32, i32, i32
  }
}

</mosaic_0001>

<bundles_post_ra>
// kernel: down_forward.1
= control target key start
LH: loop header
LB: loop body
LE: loop exit
PB: predicated region body
PF: predicated region fallthrough
CT: control target
= control target key end

     0   :  { %s780_s18 = smov 0   ;;  %s859_s0 = inlined_call_operand.vmem [shape: bf16[2,4,64], index: 0, kind: input, shape index: {}]   ;;  %s860_s1 = inlined_call_operand.vmem [shape: bf16[8,36], index: 1, kind: input, shape index: {}]   ;;  %s861_s2 = inlined_call_operand.vmem [shape: f32[8,1], index: 2, kind: input, shape index: {}]   ;;  %s862_s3 = inlined_call_operand.vmem [shape: bf16[8,72], index: 3, kind: input, shape index: {}]   ;;  %s863_s4 = inlined_call_operand.vmem [shape: f32[8,1], index: 4, kind: input, shape index: {}]   ;;  %s864_s5 = inlined_call_operand.vmem [shape: bf16[2,8,16], index: 5, kind: output, shape index: {}]  }
   0x1 LB: > { %s636_s19 = sadd.s32 4294967295, %s734_s18   ;;  %p640_p0 = scmp.ge.s32.totalorder %s734_s18, 1  ;;  %s734_s18 = sphi %s780_s18, %s15_s18  }
   0x2   : > { %p186_p1 = scmp.lt.s32.totalorder %s734_s18, 3 }
   0x4   : > { %p187_p2 = pnand %p640_p0, %p186_p1 }
   0x5   : > { %p212_p3 = scmp.lt.s32.totalorder (!%p187_p2), %s636_s19, 1  ;;  %s738_s24 = smov (!%p187_p2), 110  }
   0x6   : > { %190 = sbr.rel (%p187_p2) target bundleno = 834 (0x342), region = 40  ;;  %s739_s25 = smov (!%p187_p2), 112  }
   0x7   : > { %s740_s26 = smov (!%p187_p2), 118   ;;  %s741_s27 = smov (!%p187_p2), 119  }
   0x8   : > { %s742_s28 = smov (!%p187_p2), 111   ;;  %s743_s29 = smov (!%p187_p2), 127  }
   0x9   : > { %s745_s30 = smov (!%p187_p2), 126   ;;  %s746_s6 = smov (!%p187_p2), 120  }
   0xa   : > { %s748_s21 = smov (!%p187_p2), 124   ;;  %s749_s22 = smov (!%p187_p2), 116  }
   0xb   : > { %v230_v0 = vlaneseq  ;;  %v736_v1 = vmov 1983009808   ;;  %s866_s19 = smov (!%p212_p3, %s636_s19), 1  ;;  %v737_v5 = vmov 0.0   ;;  %vm222_vm0 = vcmask 369664   ;;  %v339_v18 = vld [vmem:[%s861_s2] sm:$0xff] }
   0xc   : > { %v228_v2 = vunpack.c.l.s4 %v736_v1  ;;  %669 = vmatprep.subr.bf16.mxu0 %v737_v5  ;;  %679 = vmatprep.subr.bf16.mxu1 %v737_v5  ;;  %s641_s20 = sshll.u32 %s866_s19, 1  ;;  %vm744_vm1 = vmmov 0   ;;  %v747_v17 = vmov 0   ;;  %vm237_vm2 = vcmask 371714   ;;  %v333_v31 = vld [vmem:[%s860_s1] sm:$0xf] }
   0xd   : > { %v231_v3 = vshrl.u32 %v230_v0, 7  ;;  %s215_s23 = scalar_lea.vmem %s859_s0, %s641_s20  ;;  %675 = vmatprep.mubr.msk.bf16.mxu0 %vm744_vm1, %v737_v5  ;;  %689 = vmatprep.mubr.msk.bf16.mxu1 %vm744_vm1, %v737_v5  ;;  %vm364_vm3 = vcmask 1041408   ;;  %vm360_vm4 = vcmask 293888   ;;  %vm410_vm5 = vcmask 371712   ;;  %v475_v47 = vld [vmem:[%s863_s4] sm:$0xff]  ;;  %s642_s15 = sshll.u32 %s866_s19, 2 }
   0xe   : > { %v229_v4 = vunpack.c.0.s8 %v228_v2  ;;  %v646_v7 = vld.sshfl [vmem:[%s215_s23] sm:$0x3 pattern:$0x76325410]  ;;  %715 = vset.pattern.permute.xlu0 %v747_v17  ;;  %vm412_vm6 = vcmask 404848   ;;  %vm415_vm7 = vcmask 257024   ;;  %s219_s20 = scalar_lea.vmem %s864_s5, %s642_s15 }
   0xf   : > { %329 = vrot.lane.b32.xlu0 %v646_v7, %s738_s24  ;;  %302 = vrot.lane.b32.xlu1 %v646_v7, %s739_s25  ;;  %v716_v8 = vld [vmem:[%s215_s23] ss:$0 sps:$4 sm:$0x33]   ;;  %vm512_vm8 = vcmask 1043456   ;;  %vm508_vm9 = vcmask 588800   ;;  %vm560_vm10 = vcmask 27648  }
  0x10   : > { %v232_v6 = vsub.s32 %v229_v4, %v231_v3  ;;  %v717_v9 = vld [vmem:[%s215_s23] ss:$0 sps:$4 sm:$0x33]   ;;  %vm567_vm11 = vcmask 60448   ;;  %vm574_vm12 = vcmask 93248   ;;  %vm581_vm13 = vcmask 126048  }
  0x11   : > { %v718_v11 = vld [vmem:[%s215_s23] ss:$0 sps:$4 sm:$0x33]  }
  0x12   : > { %v288_v10 = vrot.slane %v716_v8, %v232_v6  ;;  %v221_v12 = vld [vmem:[%s215_s23] sm:$0x3]  ;;  %v315_v13 = vrot.slane %v717_v9, %v232_v6  ;;  %v233_v14 = vrot.slane %v718_v11, %v232_v6 }
  0x13   : > { %275 = vrot.lane.b32.xlu0 %v646_v7, %s741_s27  ;;  %v719_v15 = vld [vmem:[%s215_s23] ss:$0 sps:$4 sm:$0x33]   ;;  %223 = vst.msk [vmem:[#allocation2] sm:$0x3] %vm222_vm0, %v221_v12 }
  0x14   : > { %289 = vrot.lane.b32.xlu1 %v288_v10, %s740_s26  ;;  %v261_v16 = vrot.slane %v719_v15, %v232_v6  ;;  %v465_v0 = vld [vmem:[%s862_s3] sm:$0xf] }
  0x17   : > { %316 = vrot.lane.b32.xlu0 %v315_v13, %s742_s28 }
  0x18   : > { %234 = vrot.lane.b32.xlu1 %v233_v14, %s743_s29 }
  0x1b   : > { %248 = vrot.lane.b32.xlu0 %v646_v7, %s745_s30 }
  0x1c   : > { %262 = vrot.lane.b32.xlu1 %v261_v16, %s746_s6 }
  0x1f   : > { %342 = vperm.xlu0 %715, %v339_v18  }
  0x81   : > { %v330_v19 = vpop.permute.xlu0 %329  ;;  %v303_v20 = vpop.permute.xlu1 %302 }
  0x82   : > { %332 = vst.msk [vmem:[#allocation2 + $0x10] sm:$0x3] %vm222_vm0, %v330_v19  ;;  %305 = vst.msk [vmem:[#allocation2 + $0xc] sm:$0x3] %vm222_vm0, %v303_v20 }
  0x85   : > { %v276_v22 = vpop.permute.xlu0 %275 }
  0x86   : > { %v290_v21 = vpop.permute.xlu1 %289  ;;  %278 = vst.msk [vmem:[#allocation2 + $0x8] sm:$0x3] %vm222_vm0, %v276_v22 }
  0x87   : > { %292 = vst.msk [vmem:[#allocation2 + $0x8] sm:$0xc] %vm237_vm2, %v290_v21 }
  0x89   : > { %v317_v23 = vpop.permute.xlu0 %316  ;;  %v720_v25 = vld [vmem:[#allocation2 + $0x10] ss:$0 sps:$4 sm:$0x33]  }
  0x8a   : > { %v235_v24 = vpop.permute.xlu1 %234  ;;  %319 = vst.msk [vmem:[#allocation2 + $0xc] sm:$0xc] %vm237_vm2, %v317_v23  ;;  %v366_v26 = vsel %vm364_vm3, %v720_v25, 0 }
  0x8b   : > { %238 = vst.msk [vmem:[#allocation2] sm:$0xc] %vm237_vm2, %v235_v24  ;;  %670 = vmatpush3.bf16.msra.mxu0 %v366_v26 }
  0x8c   : > { %671 = vmatprep.subr.bf16.mxu0 %v737_v5 }
  0x8d   : > { %v249_v27 = vpop.permute.xlu0 %248 }
  0x8e   : > { %v263_v28 = vpop.permute.xlu1 %262  ;;  %251 = vst.msk [vmem:[#allocation2 + $0x4] sm:$0x3] %vm222_vm0, %v249_v27 }
  0x8f   : > { %265 = vst.msk [vmem:[#allocation2 + $0x4] sm:$0xc] %vm237_vm2, %v263_v28 }
  0x91   : > { %v721_v29 = vld [vmem:[#allocation2 + $0x8] sm:$0xff]  }
  0x92   : > { %672 = vmatpush3.bf16.msra.mxu0 %v721_v29 }
  0x93   : > { %673 = vmatprep.subr.bf16.mxu0 %v737_v5 }
  0x96   : > { %v722_v30 = vld [vmem:[#allocation2] sm:$0xff]  }
  0x97   : > { %674 = vmatpush3.bf16.msra.mxu0 %v722_v30 }
  0x9a   : > { %676 = vmatmul.mubr.msk.bf16.vlgmr.msra.gmra.mxu0 %vm360_vm4, %v333_v31  ;;  %v343_v32 = vpop.permute.xlu0 %342 }
 0x15a   : > { %v402_v33 = vpop.f32.mrf.mxu0 }
 0x15b   : > { %v403_v34 = vadd.f32 %v402_v33, %v343_v32 }
 0x15c   : > { %v677_v35 = vpop.f32.mrf.mxu0 }
 0x15d   : > { %v408_v36 = vmax.f32 %v403_v34, 0.0 }
 0x15e   : > { %v405_v37 = vpop.f32.mrf.mxu0 }
 0x15f   : > { %v409_v38 = vpack.c.bf16 %v408_v36, %v408_v36 }
 0x160   : > { %v678_v39 = vpop.f32.mrf.mxu0 }
 0x161   : > { %411 = vst.msk [vmem:[#allocation3] sm:$0xf] %vm410_vm5, %v409_v38 }
 0x162   : > { %413 = vst.msk [vmem:[#allocation3] sm:$0xf] %vm412_vm6, %v747_v17 }
 0x169   : > { %v414_v40 = vld [vmem:[#allocation3] sm:$0xf] }
 0x16a   : > { %v459_v41 = vld [vmem:[#allocation3] sm:$0xf]  ;;  %416 = vst.msk [vmem:[#allocation4] sm:$0xf] %vm415_vm7, %v414_v40 }
 0x16b   : > { %v453_v42 = vld [vmem:[#allocation3] sm:$0xf]  ;;  %461 = vrot.lane.b32.xlu1 %v459_v41, %s738_s24 }
 0x16c   : > { %455 = vrot.lane.b32.xlu0 %v453_v42, %s742_s28  ;;  %v441_v43 = vld [vmem:[#allocation3] sm:$0xf] }
 0x16d   : > { %v447_v44 = vld [vmem:[#allocation3] sm:$0xf] }
 0x16e   : > { %v429_v45 = vld [vmem:[#allocation3] sm:$0xf] }
 0x16f   : > { %449 = vrot.lane.b32.xlu1 %v447_v44, %s739_s25  ;;  %v435_v46 = vld [vmem:[#allocation3] sm:$0xf] }
 0x170   : > { %443 = vrot.lane.b32.xlu0 %v441_v43, %s740_s26  ;;  %v423_v48 = vld [vmem:[#allocation3] sm:$0xf] }
 0x171   : > { %v417_v49 = vld [vmem:[#allocation3] sm:$0xf] }
 0x173   : > { %437 = vrot.lane.b32.xlu1 %v435_v46, %s741_s27 }
 0x174   : > { %431 = vrot.lane.b32.xlu0 %v429_v45, %s746_s6 }
 0x177   : > { %425 = vrot.lane.b32.xlu1 %v423_v48, %s745_s30 }
 0x178   : > { %478 = vperm.xlu0 %715, %v475_v47  }
 0x17b   : > { %419 = vrot.lane.b32.xlu1 %v417_v49, %s743_s29 }
 0x1dd   : > { %v462_v50 = vpop.permute.xlu1 %461 }
 0x1de   : > { %v456_v51 = vpop.permute.xlu0 %455  ;;  %464 = vst.msk [vmem:[#allocation4 + $0x20] sm:$0xf] %vm415_vm7, %v462_v50 }
 0x1df   : > { %458 = vst.msk [vmem:[#allocation4 + $0x1c] sm:$0xf] %vm415_vm7, %v456_v51 }
 0x1e1   : > { %v450_v52 = vpop.permute.xlu1 %449 }
 0x1e2   : > { %v444_v53 = vpop.permute.xlu0 %443  ;;  %452 = vst.msk [vmem:[#allocation4 + $0x18] sm:$0xf] %vm415_vm7, %v450_v52 }
 0x1e3   : > { %446 = vst.msk [vmem:[#allocation4 + $0x14] sm:$0xf] %vm415_vm7, %v444_v53 }
 0x1e5   : > { %v438_v54 = vpop.permute.xlu1 %437  ;;  %v723_v55 = vld [vmem:[#allocation4 + $0x20] ss:$0 sps:$4 sm:$0xff]  }
 0x1e6   : > { %v432_v56 = vpop.permute.xlu0 %431  ;;  %440 = vst.msk [vmem:[#allocation4 + $0x10] sm:$0xf] %vm415_vm7, %v438_v54  ;;  %v514_v57 = vsel %vm512_vm8, %v723_v55, 0 }
 0x1e7   : > { %434 = vst.msk [vmem:[#allocation4 + $0xc] sm:$0xf] %vm415_vm7, %v432_v56  ;;  %680 = vmatpush3.bf16.msra.mxu1 %v514_v57 }
 0x1e8   : > { %681 = vmatprep.subr.bf16.mxu1 %v737_v5 }
 0x1e9   : > { %v426_v58 = vpop.permute.xlu1 %425  ;;  %v724_v59 = vld [vmem:[#allocation4 + $0x18] sm:$0xff]  }
 0x1ea   : > { %428 = vst.msk [vmem:[#allocation4 + $0x8] sm:$0xf] %vm415_vm7, %v426_v58 }
 0x1eb   : > { %682 = vmatpush3.bf16.msra.mxu1 %v724_v59 }
 0x1ec   : > { %683 = vmatprep.subr.bf16.mxu1 %v737_v5 }
 0x1ed   : > { %v420_v60 = vpop.permute.xlu1 %419  ;;  %v725_v61 = vld [vmem:[#allocation4 + $0x10] sm:$0xff]  }
 0x1ee   : > { %422 = vst.msk [vmem:[#allocation4 + $0x4] sm:$0xf] %vm415_vm7, %v420_v60 }
 0x1ef   : > { %684 = vmatpush3.bf16.msra.mxu1 %v725_v61 }
 0x1f0   : > { %685 = vmatprep.subr.bf16.mxu1 %v737_v5 }
 0x1f1   : > { %v726_v62 = vld [vmem:[#allocation4 + $0x8] sm:$0xff]  }
 0x1f3   : > { %686 = vmatpush3.bf16.msra.mxu1 %v726_v62  ;;  %v479_v1 = vpop.permute.xlu0 %478 }
 0x1f4   : > { %687 = vmatprep.subr.bf16.mxu1 %v737_v5 }
 0x1f5   : > { %v727_v63 = vld [vmem:[#allocation4] sm:$0xff]  }
 0x1f7   : > { %688 = vmatpush3.bf16.msra.mxu1 %v727_v63 }
 0x1fa   : > { %690 = vmatmul.mubr.msk.bf16.vlgmr.msra.gmra.mxu1 %vm508_vm9, %v465_v0 }
 0x2ba   : > { %v550_v2 = vpop.f32.mrf.mxu1 }
 0x2bb   : > { %v551_v3 = vadd.f32 %v550_v2, %v479_v1 }
 0x2bc   : > { %v691_v4 = vpop.f32.mrf.mxu1 }
 0x2bd   : > { %v556_v6 = vmax.f32 %v551_v3, 0.0 }
 0x2be   : > { %v553_v7 = vpop.f32.mrf.mxu1 }
 0x2bf   : > { %v557_v8 = vpack.c.bf16 %v556_v6, %v556_v6 }
 0x2c0   : > { %v692_v9 = vpop.f32.mrf.mxu1 }
 0x2c1   : > { %558 = vst.msk [vmem:[#allocation5] sm:$0xf] %vm415_vm7, %v557_v8 }
 0x2c8   : > { %v569_v5 = vld [vmem:[#allocation5] sm:$0xf] }
 0x2c9   : > { %v562_v10 = vld [vmem:[#allocation5] sm:$0xf]  ;;  %571 = vrot.lane.b32.xlu0 %v569_v5, %s746_s6 }
 0x2ca   : > { %564 = vrot.lane.b32.xlu1 %v562_v10, %s748_s21  ;;  %v559_v11 = vld [vmem:[#allocation5] sm:$0xf] }
 0x2cb   : > { %561 = vst.msk [vmem:[%s219_s20] sm:$0xf] %vm560_vm10, %v559_v11  ;;  %v576_v12 = vld [vmem:[#allocation5] sm:$0xf] }
 0x2ce   : > { %578 = vrot.lane.b32.xlu1 %v576_v12, %s749_s22 }
 0x33b   : > { %v572_v13 = vpop.permute.xlu0 %571 }
 0x33c   : > { %v565_v14 = vpop.permute.xlu1 %564 }
 0x33d   : > { %568 = vst.msk [vmem:[%s219_s20] sm:$0xf] %vm567_vm11, %v565_v14 }
 0x33e   : > { %575 = vst.msk [vmem:[%s219_s20] sm:$0xf] %vm574_vm12, %v572_v13 }
 0x340   : > { %v579_v15 = vpop.permute.xlu1 %578 }
 0x341   : > { %582 = vst.msk [vmem:[%s219_s20] sm:$0xf] %vm581_vm13, %v579_v15 }
 0x342 PF: > { %s15_s18 = sadd.s32 1, %s734_s18  }
 0x343   : > { %p12_p4 = scmp.ge.s32.totalorder %s15_s18, 4  }
 0x345   :  { %14 = sbr.rel (!%p12_p4) target bundleno = 1 (0x1), region = 70 }

</bundles_post_ra>
